<compile_context>
chip_gen: v7x
topology: tpu7x:2x2x1
jax: 0.10.0
libtpu: 0.0.40
codegen_flags: <defaults>
</compile_context>

<pallas_src>
import jax
import jax.numpy as jnp
from jax.experimental import pallas as pl
from jax.experimental.pallas import tpu as pltpu


def _integral_kernel(x_ref, o_ref):
    """x_ref: (block_m, K) block of distribution logits, straight from HBM."""
    x = x_ref[...].astype(jnp.float32)                       # (bm, K) upcast in-register
    xt = jnp.transpose(x)                                     # (K, bm): bins->sublanes, rows->lanes (XLU)
    m = jnp.max(xt, axis=0, keepdims=True)                    # (1, bm) stable-softmax max
    e = jnp.exp(xt - m)                                        # (K, bm) EUP
    proj = jax.lax.broadcasted_iota(jnp.int32, e.shape, 0).astype(jnp.float32)  # 0..reg_max per sublane
    num = jnp.sum(e * proj, axis=0, keepdims=True)             # (1, bm) sum(exp * y)
    den = jnp.sum(e, axis=0, keepdims=True)                    # (1, bm) softmax denominator
    out = num * pl.reciprocal(den, approx=False)               # fused normalization (exact, EUP)
    o_ref[...] = out.astype(o_ref.dtype)                       # lane-dense (1, bm) store


def _round_up(v, a):
    return pl.cdiv(v, a) * a


def integral_forward(x, reg_max=16, tile_m=16384):
    """x: (N, 4*(reg_max+1)) -> (N, 4), matching Integral.forward."""
    N = x.shape[0]
    K = reg_max + 1
    assert x.shape[1] == 4 * K, "expected input of shape (N, 4*(reg_max+1))"
    M = 4 * N

    # Free (contiguous) reshape only — no HBM copy, no transpose in the wrapper.
    xr = x.reshape(M, K)

    if M <= 4096:
        # Single block: block dims equal to the full array dims are always legal,
        # and a single grid step minimizes fixed per-step overhead on v5e/v6e.
        block_m, grid_m = M, 1
    else:
        # Lane-aligned blocks (multiple of 128), capped at tile_m.  Keep the
        # step count EVEN so v7x's two TensorCores get balanced work; the cost
        # of the (at most one) extra step on single-TC chips is ~0.35 us.
        block_m = min(tile_m, _round_up(pl.cdiv(M, 2), 128))
        grid_m = pl.cdiv(M, block_m)
        if grid_m % 2 == 1:
            block_m = min(tile_m, _round_up(pl.cdiv(M, grid_m + 1), 128))
            grid_m = pl.cdiv(M, block_m)

    # VMEM budget: the (block_m, 17) f32 input block lane-pads 17 -> 128
    # (block_m * 512 B per buffer, double-buffered), plus (17->24 sublane padded,
    # block_m lane) f32 temporaries for the transposed tile / exp / products,
    # plus the small (1, block_m) output double-buffer.  Clamp below v7x's
    # 64 MiB physical VMEM.
    in_block_bytes = block_m * 128 * 4
    tr_block_bytes = 24 * block_m * 4
    out_block_bytes = 8 * block_m * 4
    vmem_limit = 2 * in_block_bytes + 6 * tr_block_bytes + 2 * out_block_bytes + (4 << 20)
    vmem_limit = int(min(max(vmem_limit, 32 << 20), 56 << 20))

    out = pl.pallas_call(
        _integral_kernel,
        out_shape=jax.ShapeDtypeStruct((1, M), x.dtype),
        grid_spec=pltpu.PrefetchScalarGridSpec(
            num_scalar_prefetch=0,
            grid=(grid_m,),
            in_specs=[pl.BlockSpec((block_m, K), lambda i: (i, 0))],
            out_specs=pl.BlockSpec((1, block_m), lambda i: (0, i)),
        ),
        compiler_params=pltpu.CompilerParams(
            dimension_semantics=("parallel",),
            vmem_limit_bytes=vmem_limit),
    )(xr)

    return out.reshape(N, 4)


def _reference(x, reg_max=16):
    K = reg_max + 1
    xr = x.reshape(-1, K).astype(jnp.float32)
    p = jax.nn.softmax(xr, axis=1)
    proj = jnp.arange(K, dtype=jnp.float32)
    return (p @ proj).astype(x.dtype).reshape(-1, 4)


if __name__ == "__main__":
    reg_max = 16

    # Small shape consistent with the module: N anchors, 4*(reg_max+1) logits.
    N_small = 8
    x_small = jax.random.normal(jax.random.PRNGKey(0),
                                (N_small, 4 * (reg_max + 1)), dtype=jnp.float32)
    y_small = jax.block_until_ready(integral_forward(x_small, reg_max=reg_max))
    y_ref_small = _reference(x_small, reg_max=reg_max)
    assert y_small.shape == (N_small, 4)
    assert jnp.allclose(y_small, y_ref_small, atol=1e-4, rtol=1e-4), "mismatch (small)"

    # Mid shape: M = 4000 -> single full-array block (no forced split).
    N_mid = 1000
    x_mid = jax.random.normal(jax.random.PRNGKey(1),
                              (N_mid, 4 * (reg_max + 1)), dtype=jnp.float32)
    y_mid = jax.block_until_ready(integral_forward(x_mid, reg_max=reg_max))
    y_ref_mid = _reference(x_mid, reg_max=reg_max)
    assert y_mid.shape == (N_mid, 4)
    assert jnp.allclose(y_mid, y_ref_mid, atol=1e-4, rtol=1e-4), "mismatch (mid)"

    # Larger shape: M = 20000 -> even multi-step grid with a ragged last block.
    N_big = 5000
    x_big = jax.random.normal(jax.random.PRNGKey(2),
                              (N_big, 4 * (reg_max + 1)), dtype=jnp.float32)
    y_big = jax.block_until_ready(integral_forward(x_big, reg_max=reg_max))
    y_ref_big = _reference(x_big, reg_max=reg_max)
    assert y_big.shape == (N_big, 4)
    assert jnp.allclose(y_big, y_ref_big, atol=1e-4, rtol=1e-4), "mismatch (big/ragged)"

    print("KERNEL_OK")
</pallas_src>

<mosaic_0001>
module attributes {stable_mosaic.version = 11 : i64} {
  func.func @_integral_kernel(%arg0: i32, %arg1: memref<32x17xf32, #tpu.memory_space<vmem>>, %arg2: memref<1x32xf32, #tpu.memory_space<vmem>>) attributes {dimension_semantics = [#tpu.dimension_semantics<parallel>], iteration_bounds = array<i64: 1>, scalar_prefetch = 0 : i64, scratch_operands = 0 : i64, tpu.core_type = #tpu.core_type<tc>, window_params = [{transform_indices = @transform_0, window_bounds = array<i64: 32, 17>}, {transform_indices = @transform_1, window_bounds = array<i64: 1, 32>}]} {
    %c0 = arith.constant 0 : index
    %c0_0 = arith.constant 0 : index
    %0 = vector.load %arg1[%c0, %c0_0] : memref<32x17xf32, #tpu.memory_space<vmem>>, vector<32x17xf32>
    %1 = tpu.transpose %0, [1, 0] : vector<32x17xf32> -> vector<17x32xf32>
    %cst = arith.constant dense<0xFF800000> : vector<32xf32>
    %2 = vector.multi_reduction <maximumf>, %1, %cst [0] : vector<17x32xf32> to vector<32xf32>
    %3 = vector.shape_cast %2 : vector<32xf32> to vector<1x32xf32>
    %4 = vector.broadcast %3 : vector<1x32xf32> to vector<17x32xf32>
    %5 = arith.subf %1, %4 : vector<17x32xf32>
    %6 = math.exp %5 : vector<17x32xf32>
    %7 = tpu.iota {dimensions = array<i32: 0>} : vector<17x32xi32>
    %8 = arith.sitofp %7 : vector<17x32xi32> to vector<17x32xf32>
    %9 = arith.mulf %6, %8 : vector<17x32xf32>
    %cst_1 = arith.constant dense<0.000000e+00> : vector<32xf32>
    %10 = vector.multi_reduction <add>, %9, %cst_1 [0] : vector<17x32xf32> to vector<32xf32>
    %11 = vector.shape_cast %10 : vector<32xf32> to vector<1x32xf32>
    %cst_2 = arith.constant dense<0.000000e+00> : vector<32xf32>
    %12 = vector.multi_reduction <add>, %6, %cst_2 [0] : vector<17x32xf32> to vector<32xf32>
    %13 = vector.shape_cast %12 : vector<32xf32> to vector<1x32xf32>
    %14 = tpu.reciprocal %13 : vector<1x32xf32> -> vector<1x32xf32>
    %15 = arith.mulf %11, %14 : vector<1x32xf32>
    %c0_3 = arith.constant 0 : index
    %c0_4 = arith.constant 0 : index
    %16 = vector.load %arg2[%c0_3, %c0_4] : memref<1x32xf32, #tpu.memory_space<vmem>>, vector<1x32xf32>
    tpu.vector_store %arg2[%c0_3, %c0_4], %15 {strides = array<i32>} : memref<1x32xf32, #tpu.memory_space<vmem>>, vector<1x32xf32>,
    return
  }
  func.func @transform_0(%arg0: i32) -> (i32, i32) {
    %c0_i32 = arith.constant 0 : i32
    %c0_i32_0 = arith.constant 0 : i32
    return %arg0, %c0_i32 : i32, i32
  }
  func.func @transform_1(%arg0: i32) -> (i32, i32) {
    %c0_i32 = arith.constant 0 : i32
    %c0_i32_0 = arith.constant 0 : i32
    return %c0_i32, %arg0 : i32, i32
  }
}

</mosaic_0001>

<bundles_post_ra>
// kernel: tpu_custom_call.1
= control target key start
LH: loop header
LB: loop body
LE: loop exit
PB: predicated region body
PF: predicated region fallthrough
CT: control target
= control target key end

     0   :  { %s195_s0 = inlined_call_operand.vmem [shape: f32[32,17], index: 0, kind: input, shape index: {}]   ;;  %s196_s1 = inlined_call_operand.hbm [shape: f32[1,32], index: 1, kind: output, shape index: {}]  }
   0x1   :  { %v9_v0 = vld [vmem:[%s195_s0] sm:$0xff] }
   0x2   :  { %13 = vxpose.xlu0.b32.start [1/4] (short) (narrow) %v9_v0, 24 }
   0x3   :  { %6 = vsyncpa [#allocation3], 0  ;;  %v10_v1 = vld [vmem:[%s195_s0 + $0x8] sm:$0xff]  ;;  %v11_v2 = vld [vmem:[%s195_s0 + $0x10] sm:$0xff]  ;;  %vm45_vm0 = vcmask 261120   ;;  %vm48_vm1 = vcmask 253952   ;;  %v67_v18 = vlaneseq }
   0x4   :  { %v12_v3 = vld [vmem:[%s195_s0 + $0x18] sm:$0xff]  ;;  %s150_s0 = smov [#allocation2]  }
   0x5   :  { %v68_v25 = vshrl.u32 %v67_v18, 7  ;;  %s108_s14 = sshll.u32 %s150_s0, 4  ;;  %s109_s14 = int_to_ptr.vmem [resolvable:$true] %s108_s14 }
   0x6   :  { %14 = vxpose.xlu0.b32.cont [2/4] (short) (narrow) %v10_v1, 24  ;;  %s126_s15 = scalar_lea.vmem %s109_s14, 16  ;;  %s130_s16 = scalar_lea.vmem %s109_s14, 32 }
   0x7   :  { %v69_v26 = vadd.s32 8, %v68_v25  ;;  %v70_v27 = vadd.s32 16, %v68_v25  ;;  %v71_v28 = vcvt.s32.f32 %v68_v25  ;;  %p127_p0 = scmp.ne.s32.totalorder %s109_s14, %s126_s15  ;;  %p131_p1 = scmp.lt.s32.totalorder %s109_s14, %s109_s14 }
   0x8   :  { %p132_p2 = scmp.lt.s32.totalorder %s130_s16, %s126_s15 }
   0x9   :  { %v72_v29 = vcvt.s32.f32 %v69_v26  ;;  %v73_v30 = vcvt.s32.f32 %v70_v27 }
   0xa   :  { %15 = vxpose.xlu0.b32.cont [3/4] (short) (narrow) %v11_v2, 24  ;;  %p133_p3 = por %p132_p2, %p131_p1 }
   0xc   :  { %p134_p4 = pnand %p133_p3, %p127_p0 }
   0xe   :  { %16 = vxpose.xlu0.b32.end [4/4] (short) (narrow) %v12_v3, 24 }
  0x82   :  { %v29_v4 = vpop.trf.xlu0 }
  0x83   :  { %v46_v7 = vsel %vm45_vm0, %v29_v4, -inf }
  0x86   :  { %v30_v5 = vpop.trf.xlu0 }
  0x87   :  { %v47_v6 = vsel %vm45_vm0, %v30_v5, -inf }
  0x88   :  { %v50_v8 = vmax.f32 %v46_v7, %v47_v6 }
  0x8a   :  { %v31_v9 = vpop.trf.xlu0 }
  0x8b   :  { %v49_v10 = vsel %vm48_vm1, %v31_v9, -inf }
  0x8c   :  { %v51_v11 = vmax.f32 %v50_v8, %v49_v10 }
  0x8e   :  { %v52_v12 = vrot.slane %v51_v11, 4 }
  0x90   :  { %v53_v13 = vmax.f32 %v51_v11, %v52_v12 }
  0x92   :  { %v54_v14 = vrot.slane %v53_v13, 2 }
  0x94   :  { %v55_v15 = vmax.f32 %v53_v13, %v54_v14 }
  0x96   :  { %v56_v16 = vrot.slane %v55_v15, 1 }
  0x98   :  { %v57_v17 = vmax.f32 %v55_v15, %v56_v16 }
  0x9a   :  { %v58_v19 = vsub.f32 %v29_v4, %v57_v17  ;;  %v59_v20 = vsub.f32 %v30_v5, %v57_v17  ;;  %v60_v21 = vsub.f32 %v31_v9, %v57_v17 }
  0x9c   :  { %v61_v22 = vmul.f32 1.442695, %v58_v19  ;;  %v63_v23 = vmul.f32 1.442695, %v59_v20  ;;  %v65_v24 = vmul.f32 1.442695, %v60_v21 }
  0x9e   :  { %118 = vpow2.f32 %v61_v22 }
  0x9f   :  { %120 = vpow2.f32 %v63_v23 }
  0xa0   :  { %122 = vpow2.f32 %v65_v24 }
  0xa8   :  { %v119_v31 = vpop.eup %118 }
  0xa9   :  { %v121_v32 = vpop.eup %120  ;;  %v74_v33 = vmul.f32 %v119_v31, %v71_v28  ;;  %v88_v34 = vsel %vm45_vm0, %v119_v31, 0.0 }
  0xaa   :  { %v123_v35 = vpop.eup %122  ;;  %v75_v36 = vmul.f32 %v121_v32, %v72_v29  ;;  %v89_v37 = vsel %vm45_vm0, %v121_v32, 0.0 }
  0xab   :  { %v76_v38 = vmul.f32 %v123_v35, %v73_v30  ;;  %v77_v39 = vsel %vm45_vm0, %v74_v33, 0.0  ;;  %v90_v40 = vadd.f32 %v89_v37, %v88_v34  ;;  %v91_v42 = vsel %vm48_vm1, %v123_v35, 0.0 }
  0xac   :  { %v78_v41 = vsel %vm45_vm0, %v75_v36, 0.0 }
  0xad   :  { %v79_v43 = vadd.f32 %v78_v41, %v77_v39  ;;  %v92_v44 = vadd.f32 %v91_v42, %v90_v40  ;;  %v80_v45 = vsel %vm48_vm1, %v76_v38, 0.0 }
  0xaf   :  { %v81_v46 = vadd.f32 %v80_v45, %v79_v43  ;;  %v93_v47 = vrot.slane %v92_v44, 4 }
  0xb1   :  { %v82_v48 = vrot.slane %v81_v46, 4  ;;  %v94_v49 = vadd.f32 %v93_v47, %v92_v44 }
  0xb3   :  { %v95_v50 = vrot.slane %v94_v49, 2  ;;  %v83_v51 = vadd.f32 %v82_v48, %v81_v46 }
  0xb5   :  { %v96_v52 = vadd.f32 %v95_v50, %v94_v49  ;;  %v84_v54 = vrot.slane %v83_v51, 2 }
  0xb7   :  { %v97_v53 = vrot.slane %v96_v52, 1  ;;  %v85_v56 = vadd.f32 %v84_v54, %v83_v51 }
  0xb9   :  { %v98_v55 = vadd.f32 %v97_v53, %v96_v52  ;;  %v86_v57 = vrot.slane %v85_v56, 1 }
  0xbb   :  { %124 = vrcp.f32 %v98_v55  ;;  %v87_v58 = vadd.f32 %v86_v57, %v85_v56 }
  0xc5   :  { %v125_v59 = vpop.eup %124 }
  0xc6   :  { %v100_v60 = vmul.f32 %v125_v59, %v87_v58 }
  0xc8   :  { %101 = vst.msk [vmem:[#allocation2] sm:$0x1] %vm48_vm1, %v100_v60 }
  0xc9   :  { %137 = shalt.err (!%p134_p4)
}
  0xca   :  { %s138_s19 = scalar_lea.hbm %s196_s1, 16 }
  0xcb   :  { %p139_p5 = scmp.ne.s32.totalorder %s196_s1, %s138_s19  ;;  %p142_p6 = scmp.lt.u32.totalorder %s138_s19, %s196_s1 }
  0xcd   :  { %p144_p7 = pnand %p142_p6, %p139_p5 }
  0xcf   :  { %147 = shalt.err (!%p144_p7)
}
  0xd0   :  { %111 = dma.vmem_to_hbm [thread:$0]  %s109_s14, 16, %s196_s1, [#allocation3]  }
  0xd1   :  { %148 = dma.done.wait [#allocation3], 16  }
  0xd2   :  { %149 = vsyncadd [#allocation3], 4294967280 }
  0xd3   :  { %115 = vsyncpa [#allocation3], 1 }

</bundles_post_ra>
